<compile_context>
chip_gen: v7x
topology: tpu7x:2x2x1
jax: 0.10.0
libtpu: 0.0.40
codegen_flags: <defaults>
</compile_context>

<pallas_src>
import functools

import jax
import jax.numpy as jnp
from jax import lax
from jax.experimental import pallas as pl
from jax.experimental.pallas import tpu as pltpu

LANE = 128            # TPU vreg lane width
_MIN_GRID_BLOCKS = 4  # >= 2 * TensorCores on v7x; also keeps the pipeline fed


# --------------------------------------------------------------------------
# Helpers
# --------------------------------------------------------------------------
def _sublane(dtype) -> int:
    """Native sublane packing: 8 for 4-byte, 16 for 2-byte, 32 for 1-byte."""
    itemsize = jnp.dtype(dtype).itemsize
    return max(8, 32 // max(1, itemsize))


def _round_up(x: int, m: int) -> int:
    return ((x + m - 1) // m) * m


def _tpu_vmem_capacity():
    """Physical VMEM per core, or None if it cannot be queried."""
    try:
        return int(pltpu.get_tpu_info().vmem_capacity_bytes)
    except Exception:
        return None


def _pick_tile_rows(k_rows, lane_width, in_dtype, out_dtype, *, is_v7x):
    """Row tile sized by a per-block HBM-byte target, aligned to the stricter
    of the input/output sublane packings, and capped so the grid keeps at
    least _MIN_GRID_BLOCKS blocks whenever the row count permits."""
    sub = max(_sublane(in_dtype), _sublane(out_dtype))
    in_b = jnp.dtype(in_dtype).itemsize
    out_b = jnp.dtype(out_dtype).itemsize
    bytes_per_row = lane_width * (in_b + out_b)     # combined in+out HBM bytes
    # v7x (3.2 TB/s) amortizes the ~0.35us/step overhead only with bigger
    # blocks; v5e/v6e already sit on the roofline at modest tiles.
    target_block_bytes = (12 << 20) if is_v7x else (4 << 20)
    max_rows = 8192 if is_v7x else 1024
    t = max(sub, target_block_bytes // bytes_per_row)
    t = min(t, max_rows)
    # Keep >= _MIN_GRID_BLOCKS grid blocks when possible (v7x megacore + overlap).
    if k_rows >= _MIN_GRID_BLOCKS * sub:
        t = min(t, k_rows // _MIN_GRID_BLOCKS)
    t = max(sub, (t // sub) * sub)
    return min(t, _round_up(k_rows, sub))


# --------------------------------------------------------------------------
# Kernels
# --------------------------------------------------------------------------
def _rmsnorm_kernel(x_ref, w_ref, o_ref, *, eps, exact_cast):
    """Standard path: one logical row per VMEM row, reduce over lanes."""
    x = x_ref[...].astype(jnp.float32)                    # (tile_rows, hidden)
    norm = jnp.mean(x * x, axis=-1, keepdims=True)
    inv = lax.rsqrt(norm + eps)
    if exact_cast:
        # Exact torch parity: downcast to x.dtype before the weight multiply.
        xnorm = (x * inv).astype(x_ref.dtype)
        o_ref[...] = (xnorm * w_ref[...]).astype(o_ref.dtype)
    else:
        # Trimmed-cast path (keeps v7x off the VALU-bound cliff).
        o_ref[...] = (x * inv * w_ref[...]).astype(o_ref.dtype)


def _rmsnorm_folded_kernel(x_ref, w_ref, seg_ref, o_ref, *, eps, hidden,
                           exact_cast):
    """Lane-dense path for hidden < 128: `fold` logical rows packed along the
    128-lane axis.  Per-row sum of squares is a segment sum over contiguous
    lane groups, done with a tiny block-diagonal matmul (mask hoisted to the
    wrapper, resident in VMEM) on the otherwise-idle MXU.  HIGHEST precision
    keeps f32 parity with torch's f32 mean; only used for tiny hidden sizes
    so the matmul stays hidden under the HBM transfer."""
    x = x_ref[...].astype(jnp.float32)                    # (tile_rows, 128)
    ss = jnp.dot(x * x, seg_ref[...],
                 precision=lax.Precision.HIGHEST,
                 preferred_element_type=jnp.float32)      # per-lane segment sum
    inv = lax.rsqrt(ss * (1.0 / hidden) + eps)
    if exact_cast:
        xnorm = (x * inv).astype(x_ref.dtype)
        o_ref[...] = (xnorm * w_ref[...]).astype(o_ref.dtype)
    else:
        o_ref[...] = (x * inv * w_ref[...]).astype(o_ref.dtype)


# --------------------------------------------------------------------------
# Wrapper
# --------------------------------------------------------------------------
def rmsnorm(x, weight, eps=1e-6, *, tile_rows=None, out_dtype=None,
            exact_cast=True, interpret=False):
    """RMSNorm over the last axis of `x`, scaled by `weight` ([hidden]).

    Numerics follow the PyTorch module (reduce in f32, cast back to x.dtype,
    multiply by weight).  out_dtype defaults to x.dtype (bf16-in -> bf16-out,
    the HBM-roofline default); pass out_dtype="promote" for torch's exact
    output promotion (f32 when the weight is f32).
    """
    orig_shape = x.shape
    hidden = orig_shape[-1]
    assert weight.shape == (hidden,)
    if out_dtype is None:
        out_dtype = x.dtype
    elif isinstance(out_dtype, str) and out_dtype == "promote":
        out_dtype = jnp.promote_types(x.dtype, weight.dtype)
    out_dtype = jnp.dtype(out_dtype)

    x2d = x.reshape(-1, hidden)
    rows = x2d.shape[0]
    sub = max(_sublane(x.dtype), _sublane(out_dtype))

    # Lane-dense folding: pack `fold` consecutive rows into one 128-lane slab
    # (pure metadata reshape, no extra HBM traffic) when hidden < 128.
    fold = 1
    if hidden % LANE != 0 and LANE % hidden == 0:
        f = LANE // hidden
        if rows % f == 0:
            fold = f
    # TODO(synk): rows % fold != 0 falls back to the sub-128-lane path (masked
    # partial stores, perf cliff only); padding rows would add an HBM copy.

    extra_inputs = []
    extra_specs = []
    if fold > 1:
        lane_width = fold * hidden
        xk = x2d.reshape(rows // fold, lane_width)
        wk = jnp.tile(weight, fold).reshape(1, lane_width)
        # Hoisted block-diagonal segment mask (resident in VMEM, <= 64 KiB).
        seg_ids = jnp.arange(lane_width, dtype=jnp.int32) // hidden
        seg = (seg_ids[:, None] == seg_ids[None, :]).astype(jnp.float32)
        extra_inputs = [seg]
        extra_specs = [pl.BlockSpec((lane_width, lane_width),
                                    lambda i: (0, 0))]
        kernel = functools.partial(_rmsnorm_folded_kernel, eps=eps,
                                   hidden=hidden, exact_cast=exact_cast)
        k_rows = rows // fold
    else:
        lane_width = hidden
        xk = x2d
        wk = weight.reshape(1, hidden)
        kernel = functools.partial(_rmsnorm_kernel, eps=eps,
                                   exact_cast=exact_cast)
        k_rows = rows

    vmem_cap = _tpu_vmem_capacity()
    is_v7x = vmem_cap is not None and vmem_cap <= (80 << 20)

    if tile_rows is None:
        tile_rows = _pick_tile_rows(k_rows, lane_width, x.dtype, out_dtype,
                                    is_v7x=is_v7x)
    else:
        tile_rows = _round_up(max(int(tile_rows), sub), sub)
        tile_rows = max(sub, min(tile_rows, _round_up(k_rows, sub)))

    grid = (pl.cdiv(k_rows, tile_rows),)  # ragged last block masked by Pallas

    # Request only the VMEM actually used: double-buffered in+out tiles,
    # the small resident weight / seg mask, f32 intermediates, + slack.
    in_b = jnp.dtype(x.dtype).itemsize
    out_b = out_dtype.itemsize
    tile_bytes = tile_rows * lane_width * (in_b + out_b)
    aux_bytes = 2 * lane_width * 4
    if fold > 1:
        aux_bytes += 2 * lane_width * lane_width * 4
    slack = (4 << 20) + 2 * tile_rows * lane_width * 4
    vmem_limit = int(min(max(2 * tile_bytes + aux_bytes + slack, 16 << 20),
                         64 << 20))

    out2d = pl.pallas_call(
        kernel,
        out_shape=jax.ShapeDtypeStruct((k_rows, lane_width), out_dtype),
        grid_spec=pltpu.PrefetchScalarGridSpec(
            num_scalar_prefetch=0,
            grid=grid,
            in_specs=[
                pl.BlockSpec((tile_rows, lane_width), lambda i: (i, 0)),
                pl.BlockSpec((1, lane_width), lambda i: (0, 0)),
            ] + extra_specs,
            out_specs=pl.BlockSpec((tile_rows, lane_width), lambda i: (i, 0)),
        ),
        compiler_params=pltpu.CompilerParams(
            dimension_semantics=("parallel",),
            vmem_limit_bytes=vmem_limit,
        ),
        interpret=interpret,
    )(xk, wk, *extra_inputs)

    return out2d.reshape(orig_shape)


# --------------------------------------------------------------------------
# Reference (mirrors the PyTorch RMSNorm.forward exactly; output is the
# torch promotion dtype)
# --------------------------------------------------------------------------
def _rmsnorm_ref(x, weight, eps):
    xf = x.astype(jnp.float32)
    norm = jnp.mean(xf * xf, axis=-1, keepdims=True)
    xnorm = (xf * lax.rsqrt(norm + eps)).astype(x.dtype)
    return xnorm * weight


if __name__ == "__main__":
    eps = 1e-6
    key = jax.random.PRNGKey(0)
    k1, k2, k3, k4 = jax.random.split(key, 4)

    # --- Case 1: module-shaped demo (GPT with n_embd=32, batch=2, seq=8).
    #     hidden=32 < 128 -> folded lane-dense path (4 rows per 128-lane slab).
    batch, seq, hidden = 2, 8, 32
    x1 = jax.random.normal(k1, (batch, seq, hidden), dtype=jnp.float32)
    w1 = jnp.ones((hidden,), dtype=jnp.float32)  # RMSNorm init: torch.ones
    out1 = jax.block_until_ready(rmsnorm(x1, w1, eps))
    ref1 = _rmsnorm_ref(x1, w1, eps)
    assert out1.shape == ref1.shape and out1.dtype == jnp.float32
    assert jnp.allclose(out1, ref1, atol=1e-4, rtol=1e-4)

    # --- Case 2: bf16 activations, f32 weight, ragged row count, hidden=128.
    #     Default out_dtype = x.dtype (bf16) -> lane-dense bf16 writes.
    x2 = jax.random.normal(k2, (2, 13, 128), dtype=jnp.float32).astype(jnp.bfloat16)
    w2 = jax.random.normal(k3, (128,), dtype=jnp.float32) * 0.1 + 1.0
    ref2 = _rmsnorm_ref(x2, w2, eps)                       # torch-promoted f32
    out2 = jax.block_until_ready(rmsnorm(x2, w2, eps, tile_rows=8))
    assert out2.shape == ref2.shape and out2.dtype == jnp.bfloat16
    assert jnp.allclose(out2.astype(jnp.float32),
                        ref2.astype(jnp.bfloat16).astype(jnp.float32),
                        atol=2e-2, rtol=2e-2)
    #     Torch-exact promotion path on request.
    out2b = jax.block_until_ready(rmsnorm(x2, w2, eps, out_dtype="promote"))
    assert out2b.dtype == ref2.dtype == jnp.float32
    assert jnp.allclose(out2b, ref2, atol=1e-2, rtol=1e-2)

    # --- Case 3: wider hidden, auto tile sizing, ragged last block; also
    #     exercise the trimmed-cast path (identical for f32 inputs).
    x3 = jax.random.normal(k4, (2, 257, 256), dtype=jnp.float32)
    w3 = jnp.full((256,), 0.5, dtype=jnp.float32)
    ref3 = _rmsnorm_ref(x3, w3, eps)
    out3 = jax.block_until_ready(rmsnorm(x3, w3, eps))
    assert out3.shape == ref3.shape and out3.dtype == ref3.dtype
    assert jnp.allclose(out3, ref3, atol=2e-5, rtol=2e-5)
    out3b = jax.block_until_ready(rmsnorm(x3, w3, eps, exact_cast=False))
    assert jnp.allclose(out3b, ref3, atol=2e-5, rtol=2e-5)

    print("KERNEL_OK")
</pallas_src>

<mosaic_0001>
module attributes {stable_mosaic.version = 11 : i64} {
  func.func @_rmsnorm_folded_kernel(%arg0: i32, %arg1: memref<8x128xf32, #tpu.memory_space<vmem>>, %arg2: memref<1x128xf32, #tpu.memory_space<vmem>>, %arg3: memref<128x128xf32, #tpu.memory_space<vmem>>, %arg4: memref<8x128xf32, #tpu.memory_space<vmem>>) attributes {dimension_semantics = [#tpu.dimension_semantics<parallel>], iteration_bounds = array<i64: 1>, scalar_prefetch = 0 : i64, scratch_operands = 0 : i64, tpu.core_type = #tpu.core_type<tc>, window_params = [{transform_indices = @transform_0, window_bounds = array<i64: 8, 128>}, {pipeline_mode = #tpu.pipeline_mode<synchronous>, transform_indices = @transform_1, window_bounds = array<i64: 1, 128>}, {pipeline_mode = #tpu.pipeline_mode<synchronous>, transform_indices = @transform_2, window_bounds = array<i64: 128, 128>}, {transform_indices = @transform_3, window_bounds = array<i64: 8, 128>}]} {
    %c0 = arith.constant 0 : index
    %c0_0 = arith.constant 0 : index
    %0 = vector.load %arg1[%c0, %c0_0] : memref<8x128xf32, #tpu.memory_space<vmem>>, vector<8x128xf32>
    %1 = arith.mulf %0, %0 : vector<8x128xf32>
    %c0_1 = arith.constant 0 : index
    %c0_2 = arith.constant 0 : index
    %2 = vector.load %arg3[%c0_1, %c0_2] : memref<128x128xf32, #tpu.memory_space<vmem>>, vector<128x128xf32>
    %cst = arith.constant dense<0.000000e+00> : vector<8x128xf32>
    %3 = tpu.matmul %1, %2, %cst {dimension_numbers = #tpu.dot_dimension_numbers<[1], [0], [0], [1], [0, 0, 1, 1], [], []>, precision = #tpu.contract_precision<fp32>} : vector<8x128xf32>, vector<128x128xf32>, vector<8x128xf32> -> vector<8x128xf32>
    %cst_3 = arith.constant 3.125000e-02 : f32
    %4 = vector.broadcast %cst_3 : f32 to vector<8x128xf32>
    %5 = arith.mulf %3, %4 : vector<8x128xf32>
    %cst_4 = arith.constant 9.99999997E-7 : f32
    %6 = vector.broadcast %cst_4 : f32 to vector<8x128xf32>
    %7 = arith.addf %5, %6 : vector<8x128xf32>
    %8 = math.rsqrt %7 : vector<8x128xf32>
    %9 = arith.mulf %0, %8 : vector<8x128xf32>
    %c0_5 = arith.constant 0 : index
    %c0_6 = arith.constant 0 : index
    %10 = vector.load %arg2[%c0_5, %c0_6] : memref<1x128xf32, #tpu.memory_space<vmem>>, vector<1x128xf32>
    %11 = vector.broadcast %10 : vector<1x128xf32> to vector<8x128xf32>
    %12 = arith.mulf %9, %11 : vector<8x128xf32>
    %c0_7 = arith.constant 0 : index
    %c0_8 = arith.constant 0 : index
    %13 = vector.load %arg4[%c0_7, %c0_8] : memref<8x128xf32, #tpu.memory_space<vmem>>, vector<8x128xf32>
    tpu.vector_store %arg4[%c0_7, %c0_8], %12 {strides = array<i32>} : memref<8x128xf32, #tpu.memory_space<vmem>>, vector<8x128xf32>,
    return
  }
  func.func @transform_0(%arg0: i32) -> (i32, i32) {
    %c0_i32 = arith.constant 0 : i32
    %c0_i32_0 = arith.constant 0 : i32
    return %arg0, %c0_i32 : i32, i32
  }
  func.func @transform_1(%arg0: i32) -> (i32, i32) {
    %c0_i32 = arith.constant 0 : i32
    %c0_i32_0 = arith.constant 0 : i32
    %c0_i32_1 = arith.constant 0 : i32
    return %c0_i32, %c0_i32_0 : i32, i32
  }
  func.func @transform_2(%arg0: i32) -> (i32, i32) {
    %c0_i32 = arith.constant 0 : i32
    %c0_i32_0 = arith.constant 0 : i32
    %c0_i32_1 = arith.constant 0 : i32
    return %c0_i32, %c0_i32_0 : i32, i32
  }
  func.func @transform_3(%arg0: i32) -> (i32, i32) {
    %c0_i32 = arith.constant 0 : i32
    %c0_i32_0 = arith.constant 0 : i32
    return %arg0, %c0_i32 : i32, i32
  }
}

</mosaic_0001>

<bundles_post_ra>
// kernel: tpu_custom_call.1
= control target key start
LH: loop header
LB: loop body
LE: loop exit
PB: predicated region body
PF: predicated region fallthrough
CT: control target
= control target key end

     0   :  { %8 = vsyncpa [#allocation3], 0  ;;  %s1610_s0 = inlined_call_operand.hbm [shape: f32[4,128], index: 0, kind: input, shape index: {}]   ;;  %s1611_s1 = inlined_call_operand.vmem [shape: f32[1,128], index: 1, kind: input, shape index: {}]   ;;  %s1612_s2 = inlined_call_operand.hbm [shape: f32[128,128], index: 2, kind: input, shape index: {}]   ;;  %s1613_s3 = inlined_call_operand.hbm [shape: f32[4,128], index: 3, kind: output, shape index: {}]  }
   0x1   :  { %9 = vsyncpa [#allocation6], 0 }
   0x2   :  { %10 = vsyncpa [#allocation4], 0 }
   0x3   :  { %15 = vsyncadd [#allocation3], 64  ;;  %s1283_s12 = smov [#allocation2]   ;;  %s1211_s16 = scalar_lea.hbm %s1610_s0, 64 }
   0x4   :  { %s16_s13 = sshll.u32 %s1283_s12, 4  ;;  %p1212_p0 = scmp.ne.s32.totalorder %s1610_s0, %s1211_s16  ;;  %s17_s13 = int_to_ptr.vmem [resolvable:$true] %s16_s13 }
   0x5   :  { %p1215_p1 = scmp.lt.u32.totalorder %s1211_s16, %s1610_s0 }
   0x7   :  { %p1217_p2 = pnand %p1215_p1, %p1212_p0 }
   0x9   :  { %1220 = shalt.err (!%p1217_p2)
}
   0xa   :  { %s1221_s21 = scalar_lea.vmem %s17_s13, 64  ;;  %s1225_s22 = scalar_lea.vmem %s17_s13, 128 }
   0xb   :  { %p1222_p3 = scmp.ne.s32.totalorder %s17_s13, %s1221_s21  ;;  %p1226_p4 = scmp.lt.s32.totalorder %s17_s13, %s17_s13 }
   0xc   :  { %p1227_p5 = scmp.lt.s32.totalorder %s1225_s22, %s1221_s21 }
   0xe   :  { %p1228_p6 = por %p1227_p5, %p1226_p4 }
  0x10   :  { %p1229_p7 = pnand %p1228_p6, %p1222_p3 }
  0x12   :  { %1232 = shalt.err (!%p1229_p7)
}
  0x13   :  { %s1284_s23 = smov 64   ;;  %s1285_s24 = smov 4  }
  0x14   :  { %22 = dma.hbm_to_vmem [thread:$0]  %s1610_s0, 64, %s17_s13, [#allocation3], %s1284_s23, %s1284_s23, %s1285_s24  }
  0x15   :  { %s1286_s27 = smov [#allocation5]   ;;  %s1233_s4 = scalar_lea.hbm %s1612_s2, 2048 }
  0x16   :  { %s30_s28 = sshll.u32 %s1286_s27, 4  ;;  %p1234_p8 = scmp.ne.s32.totalorder %s1612_s2, %s1233_s4  ;;  %s31_s28 = int_to_ptr.vmem [resolvable:$true] %s30_s28 }
  0x17   :  { %p1237_p9 = scmp.lt.u32.totalorder %s1233_s4, %s1612_s2 }
  0x19   :  { %p1239_p10 = pnand %p1237_p9, %p1234_p8 }
  0x1b   :  { %1242 = shalt.err (!%p1239_p10)
}
  0x1c   :  { %s1243_s9 = scalar_lea.vmem %s31_s28, 2048  ;;  %p1248_p12 = scmp.lt.s32.totalorder %s31_s28, %s31_s28 }
  0x1d   :  { %p1244_p11 = scmp.ne.s32.totalorder %s31_s28, %s1243_s9  ;;  %p1249_p13 = scmp.lt.s32.totalorder %s1243_s9, %s1243_s9 }
  0x1f   :  { %p1250_p0 = por %p1249_p13, %p1248_p12 }
  0x21   :  { %p1251_p1 = pnand %p1250_p0, %p1244_p11 }
  0x23   :  { %1254 = shalt.err (!%p1251_p1)
}
  0x24   :  { %s1287_s0 = smov 128   ;;  %s1288_s10 = smov 8  }
  0x25   :  { %36 = dma.hbm_to_vmem [thread:$0]  %s1612_s2, 2048, %s31_s28, [#allocation6], %s1287_s0, %s1287_s0, %s1288_s10  }
  0x26   :  { %1277 = dma.done.wait [#allocation3], 128  }
  0x27   :  { %1278 = vsyncadd [#allocation3], 4294967168 }
  0x28   :  { %1279 = dma.done.wait [#allocation6], 2048  }
  0x29   :  { %1280 = vsyncadd [#allocation6], 4294965248  ;;  %v1289_v0 = vmov 0.0|0.0   ;;  %vm1290_vm0 = vmmov 0   ;;  %v1291_v1 = vmov 0.0   ;;  %v45_v2 = vld [vmem:[#allocation5] sm:$0xff] }
  0x2a   :  { %1046 = vmatprep.subr.bf16.mxu1 %v1289_v0  ;;  %1118 = vmatprep.subr.bf16.mxu0 %v1289_v0  ;;  %v46_v3 = vld [vmem:[#allocation5 + $0x8] sm:$0xff]  ;;  %v47_v4 = vld [vmem:[#allocation5 + $0x10] sm:$0xff]  ;;  %v62_v5 = vand.u32 4294901760, %v45_v2  ;;  %v48_v7 = vld [vmem:[#allocation5 + $0x18] sm:$0xff] }
  0x2b   :  { %868 = vmatprep.mubr.msk.f32.mxu1 %vm1290_vm0, %v1291_v1  ;;  %973 = vmatprep.mubr.msk.f32.mxu0 %vm1290_vm0, %v1291_v1  ;;  %v65_v6 = vand.u32 4294901760, %v46_v3  ;;  %v68_v8 = vand.u32 4294901760, %v47_v4  ;;  %v71_v9 = vand.u32 4294901760, %v48_v7  ;;  %v49_v10 = vld [vmem:[#allocation5 + $0x20] sm:$0xff]  ;;  %v50_v11 = vld [vmem:[#allocation5 + $0x28] sm:$0xff]  ;;  %v51_v16 = vld [vmem:[#allocation5 + $0x30] sm:$0xff] }
  0x2c   :  { %v74_v14 = vand.u32 4294901760, %v49_v10  ;;  %v77_v15 = vand.u32 4294901760, %v50_v11  ;;  %v52_v17 = vld [vmem:[#allocation5 + $0x38] sm:$0xff]  ;;  %v80_v19 = vand.u32 4294901760, %v51_v16  ;;  %v1362_v22 = vld [vmem:[#allocation5 + $0x40] sm:$0xff]  ;;  %v1364_v23 = vld [vmem:[#allocation5 + $0x48] sm:$0xff]  ;;  %v1380_v30 = vsub.f32 %v45_v2, %v62_v5 }
  0x2d   :  { %v1346_v12 = vpack.c.bf16 %v65_v6, %v62_v5  ;;  %v1350_v13 = vpack.c.bf16 %v71_v9, %v68_v8  ;;  %v83_v20 = vand.u32 4294901760, %v52_v17  ;;  %v1358_v21 = vld [vmem:[#allocation2] sm:$0xff]  ;;  %v86_v26 = vand.u32 4294901760, %v1362_v22  ;;  %v1376_v28 = vld [vmem:[#allocation5 + $0x50] sm:$0xff]  ;;  %v1392_v36 = vld [vmem:[#allocation5 + $0x60] sm:$0xff] }
  0x2e   :  { %v1356_v18 = vpack.c.bf16 %v77_v15, %v74_v14  ;;  %v44_v24 = vmul.f32 %v1358_v21, %v1358_v21  ;;  %v89_v27 = vand.u32 4294901760, %v1364_v23  ;;  %v1378_v29 = vld [vmem:[#allocation5 + $0x58] sm:$0xff]  ;;  %v1384_v32 = vsub.f32 %v46_v3, %v65_v6  ;;  %v1396_v37 = vld [vmem:[#allocation5 + $0x68] sm:$0xff]  ;;  %v1415_v44 = vld [vmem:[#allocation5 + $0x70] sm:$0xff] }
  0x2f   :  { %1048 = vmatpush3.bf16.msra.mxu1 %v1346_v12  ;;  %1120 = vmatpush3.bf16.msra.mxu0 %v1346_v12  ;;  %v1370_v25 = vpack.c.bf16 %v83_v20, %v80_v19  ;;  %v92_v34 = vand.u32 4294901760, %v1376_v28  ;;  %v95_v35 = vand.u32 4294901760, %v1378_v29  ;;  %v1398_v38 = vsub.f32 %v47_v4, %v68_v8  ;;  %v1417_v45 = vld [vmem:[#allocation5 + $0x78] sm:$0xff] }
  0x30   :  { %1049 = vmatprep.subr.bf16.mxu1 %v1289_v0  ;;  %1121 = vmatprep.subr.bf16.mxu0 %v1289_v0  ;;  %v1382_v31 = vand.u32 4294901760, %v44_v24  ;;  %v1388_v33 = vpack.c.bf16 %v89_v27, %v86_v26  ;;  %v1400_v39 = vsub.f32 %v48_v7, %v71_v9  ;;  %v98_v40 = vand.u32 4294901760, %v1392_v36 }
  0x31   :  { %v1412_v42 = vpack.c.bf16 %v95_v35, %v92_v34  ;;  %v101_v43 = vand.u32 4294901760, %v1396_v37  ;;  %v155_v46 = vand.u32 4294901760, %v1380_v30  ;;  %v162_v47 = vand.u32 4294901760, %v1384_v32 }
  0x32   :  { %v1404_v41 = vsub.f32 %v44_v24, %v1382_v31  ;;  %v1423_v48 = vsub.f32 %v49_v10, %v74_v14  ;;  %v1425_v49 = vsub.f32 %v50_v11, %v77_v15  ;;  %v104_v50 = vand.u32 4294901760, %v1415_v44 }
  0x33   :  { %1051 = vmatpush3.bf16.msra.mxu1 %v1350_v13  ;;  %1123 = vmatpush3.bf16.msra.mxu0 %v1350_v13  ;;  %v107_v51 = vand.u32 4294901760, %v1417_v45  ;;  %v169_v53 = vand.u32 4294901760, %v1398_v38  ;;  %v1437_v54 = vpack.c.bf16 %v101_v43, %v98_v40  ;;  %v156_v55 = vsub.f32 %v1380_v30, %v155_v46 }
  0x34   :  { %1052 = vmatprep.subr.bf16.mxu1 %v1289_v0  ;;  %1124 = vmatprep.subr.bf16.mxu0 %v1289_v0  ;;  %v144_v52 = vand.u32 4294901760, %v1404_v41  ;;  %v163_v56 = vsub.f32 %v1384_v32, %v162_v47  ;;  %v176_v57 = vand.u32 4294901760, %v1400_v39  ;;  %v1444_v58 = vsub.f32 %v51_v16, %v80_v19 }
  0x35   :  { %v1446_v59 = vsub.f32 %v52_v17, %v83_v20  ;;  %v170_v61 = vsub.f32 %v1398_v38, %v169_v53  ;;  %v183_v62 = vand.u32 4294901760, %v1423_v48  ;;  %v190_v63 = vand.u32 4294901760, %v1425_v49 }
  0x36   :  { %v145_v60 = vsub.f32 %v1404_v41, %v144_v52  ;;  %v1458_v2 = vpack.c.bf16 %v107_v51, %v104_v50  ;;  %v157_v3 = vand.u32 4294901760, %v156_v55  ;;  %v164_v4 = vand.u32 4294901760, %v163_v56 }
  0x37   :  { %1054 = vmatpush3.bf16.msra.mxu1 %v1356_v18  ;;  %1126 = vmatpush3.bf16.msra.mxu0 %v1356_v18  ;;  %v177_v5 = vsub.f32 %v1400_v39, %v176_v57  ;;  %v1464_v6 = vsub.f32 %v1362_v22, %v86_v26  ;;  %v1467_v7 = vsub.f32 %v1364_v23, %v89_v27  ;;  %v171_v10 = vand.u32 4294901760, %v170_v61 }
  0x38   :  { %1055 = vmatprep.subr.bf16.mxu1 %v1289_v0  ;;  %1127 = vmatprep.subr.bf16.mxu0 %v1289_v0  ;;  %v1143_v8 = vpack.c.bf16 %v162_v47, %v155_v46  ;;  %v146_v9 = vand.u32 4294901760, %v145_v60  ;;  %v184_v11 = vsub.f32 %v1423_v48, %v183_v62  ;;  %v191_v14 = vsub.f32 %v1425_v49, %v190_v63 }
  0x39   :  { %v1071_v15 = vpack.c.bf16 %v164_v4, %v157_v3  ;;  %v178_v16 = vand.u32 4294901760, %v177_v5  ;;  %v197_v17 = vand.u32 4294901760, %v1444_v58  ;;  %v204_v19 = vand.u32 4294901760, %v1446_v59 }
  0x3a   :  { %v1480_v20 = vsub.f32 %v1376_v28, %v92_v34  ;;  %v1485_v22 = vsub.f32 %v1378_v29, %v95_v35  ;;  %v1146_v23 = vpack.c.bf16 %v176_v57, %v169_v53  ;;  %v185_v24 = vand.u32 4294901760, %v184_v11 }
  0x3b   :  { %1057 = vmatpush3.bf16.msra.mxu1 %v1370_v25  ;;  %1129 = vmatpush3.bf16.msra.mxu0 %v1370_v25  ;;  %v192_v26 = vand.u32 4294901760, %v191_v14  ;;  %v211_v27 = vand.u32 4294901760, %v1464_v6  ;;  %v1074_v46 = vpack.c.bf16 %v178_v16, %v171_v10  ;;  %v198_v47 = vsub.f32 %v1444_v58, %v197_v17 }
  0x3c   :  { %1058 = vmatprep.subr.bf16.mxu1 %v1289_v0  ;;  %1130 = vmatprep.subr.bf16.mxu0 %v1289_v0  ;;  %v205_v28 = vsub.f32 %v1446_v59, %v204_v19  ;;  %v218_v34 = vand.u32 4294901760, %v1467_v7  ;;  %v1496_v29 = vsub.f32 %v1392_v36, %v98_v40  ;;  %v1501_v35 = vsub.f32 %v1396_v37, %v101_v43 }
  0x3d   :  { %v1149_v53 = vpack.c.bf16 %v190_v63, %v183_v62  ;;  %v212_v55 = vsub.f32 %v1464_v6, %v211_v27  ;;  %v225_v56 = vand.u32 4294901760, %v1480_v20  ;;  %v199_v36 = vand.u32 4294901760, %v198_v47 }
  0x3e   :  { %v206_v40 = vand.u32 4294901760, %v205_v28  ;;  %v219_v57 = vsub.f32 %v1467_v7, %v218_v34  ;;  %v232_v37 = vand.u32 4294901760, %v1485_v22  ;;  %v1516_v43 = vsub.f32 %v1415_v44, %v104_v50 }
  0x3f   :  { %1060 = vmatpush3.bf16.msra.mxu1 %v1388_v33  ;;  %1132 = vmatpush3.bf16.msra.mxu0 %v1388_v33  ;;  %v1521_v60 = vsub.f32 %v1417_v45, %v107_v51  ;;  %v1152_v61 = vpack.c.bf16 %v204_v19, %v197_v17  ;;  %v213_v62 = vand.u32 4294901760, %v212_v55  ;;  %v226_v63 = vsub.f32 %v1480_v20, %v225_v56 }
  0x40   :  { %1061 = vmatprep.subr.bf16.mxu1 %v1289_v0  ;;  %1133 = vmatprep.subr.bf16.mxu0 %v1289_v0  ;;  %v239_v3 = vand.u32 4294901760, %v1496_v29  ;;  %v1080_v4 = vpack.c.bf16 %v206_v40, %v199_v36  ;;  %v220_v5 = vand.u32 4294901760, %v219_v57  ;;  %v246_v44 = vand.u32 4294901760, %v1501_v35 }
  0x41   :  { %v1155_v45 = vpack.c.bf16 %v218_v34, %v211_v27  ;;  %v227_v50 = vand.u32 4294901760, %v226_v63  ;;  %v1158_v16 = vpack.c.bf16 %v232_v37, %v225_v56  ;;  %v1098_v55 = vpack.c.bf16 %v1400_v39, %v1398_v38 }
  0x42   :  { %v240_v51 = vsub.f32 %v1496_v29, %v239_v3  ;;  %v1083_v10 = vpack.c.bf16 %v220_v5, %v213_v62  ;;  %v247_v14 = vsub.f32 %v1501_v35, %v246_v44 }
  0x43   :  { %1063 = vmatpush3.bf16.msra.mxu1 %v1412_v42  ;;  %1135 = vmatpush3.bf16.msra.mxu0 %v1412_v42 }
  0x44   :  { %1064 = vmatprep.subr.bf16.mxu1 %v1289_v0  ;;  %1136 = vmatprep.subr.bf16.mxu0 %v1289_v0  ;;  %v241_v17 = vand.u32 4294901760, %v240_v51 }
  0x47   :  { %1066 = vmatpush3.bf16.msra.mxu1 %v1437_v54  ;;  %1138 = vmatpush3.bf16.msra.mxu0 %v1437_v54 }
  0x48   :  { %1067 = vmatprep.subr.bf16.mxu1 %v1289_v0  ;;  %1139 = vmatprep.subr.bf16.mxu0 %v1289_v0 }
  0x4b   :  { %1069 = vmatpush3.bf16.msra.mxu1 %v1458_v2  ;;  %1141 = vmatpush3.bf16.msra.mxu0 %v1458_v2 }
  0x4c   :  { %1070 = vmatprep.subr.bf16.mxu1 %v1289_v0  ;;  %1142 = vmatprep.subr.bf16.mxu0 %v1289_v0 }
  0x4e   :  { %869 = vmatmul.mubr.f32.vlgmr.msra.gmra.mrb[0].mxu1 %v146_v9  ;;  %974 = vmatmul.mubr.f32.vlgmr.msra.gmra.mrb[0].mxu0 %v144_v52  ;;  %v1077_v52 = vpack.c.bf16 %v192_v26, %v185_v24  ;;  %v253_v9 = vand.u32 4294901760, %v1516_v43 }
  0x4f   :  { %1072 = vmatpush3.bf16.msra.mxu1 %v1071_v15  ;;  %1144 = vmatpush3.bf16.msra.mxu0 %v1143_v8  ;;  %v233_v8 = vsub.f32 %v1485_v22, %v232_v37  ;;  %v260_v15 = vand.u32 4294901760, %v1521_v60 }
  0x50   :  { %1073 = vmatprep.subr.bf16.mxu1 %v1289_v0  ;;  %1145 = vmatprep.subr.bf16.mxu0 %v1289_v0  ;;  %v254_v24 = vsub.f32 %v1516_v43, %v253_v9 }
  0x51   :  { %903 = vmatprep.mubr.msk.f32.mxu1 %vm1290_vm0, %v1291_v1  ;;  %1008 = vmatprep.mubr.msk.f32.mxu0 %vm1290_vm0, %v1291_v1  ;;  %v234_v11 = vand.u32 4294901760, %v233_v8  ;;  %v261_v26 = vsub.f32 %v1521_v60, %v260_v15 }
  0x52   :  { %v255_v47 = vand.u32 4294901760, %v254_v24 }
  0x53   :  { %1075 = vmatpush3.bf16.msra.mxu1 %v1074_v46  ;;  %1147 = vmatpush3.bf16.msra.mxu0 %v1146_v23  ;;  %v1086_v19 = vpack.c.bf16 %v234_v11, %v227_v50  ;;  %v248_v23 = vand.u32 4294901760, %v247_v14  ;;  %v1161_v46 = vpack.c.bf16 %v246_v44, %v239_v3  ;;  %v262_v28 = vand.u32 4294901760, %v261_v26 }
  0x54   :  { %1076 = vmatprep.subr.bf16.mxu1 %v1289_v0  ;;  %1148 = vmatprep.subr.bf16.mxu0 %v1289_v0 }
  0x55   :  { %v1089_v27 = vpack.c.bf16 %v248_v23, %v241_v17  ;;  %v1092_v34 = vpack.c.bf16 %v262_v28, %v255_v47 }
  0x57   :  { %1078 = vmatpush3.bf16.msra.mxu1 %v1077_v52  ;;  %1150 = vmatpush3.bf16.msra.mxu0 %v1149_v53  ;;  %v1164_v52 = vpack.c.bf16 %v260_v15, %v253_v9  ;;  %v1095_v53 = vpack.c.bf16 %v1384_v32, %v1380_v30  ;;  %v1101_v30 = vpack.c.bf16 %v1425_v49, %v1423_v48 }
  0x58   :  { %1079 = vmatprep.subr.bf16.mxu1 %v1289_v0  ;;  %1151 = vmatprep.subr.bf16.mxu0 %v1289_v0 }
  0x5b   :  { %1081 = vmatpush3.bf16.msra.mxu1 %v1080_v4  ;;  %1153 = vmatpush3.bf16.msra.mxu0 %v1152_v61 }
  0x5c   :  { %1082 = vmatprep.subr.bf16.mxu1 %v1289_v0  ;;  %1154 = vmatprep.subr.bf16.mxu0 %v1289_v0 }
  0x5f   :  { %1084 = vmatpush3.bf16.msra.mxu1 %v1083_v10  ;;  %1156 = vmatpush3.bf16.msra.mxu0 %v1155_v45 }
  0x60   :  { %1085 = vmatprep.subr.bf16.mxu1 %v1289_v0  ;;  %1157 = vmatprep.subr.bf16.mxu0 %v1289_v0 }
  0x63   :  { %1087 = vmatpush3.bf16.msra.mxu1 %v1086_v19  ;;  %1159 = vmatpush3.bf16.msra.mxu0 %v1158_v16 }
  0x64   :  { %1088 = vmatprep.subr.bf16.mxu1 %v1289_v0  ;;  %1160 = vmatprep.subr.bf16.mxu0 %v1289_v0 }
  0x67   :  { %1090 = vmatpush3.bf16.msra.mxu1 %v1089_v27  ;;  %1162 = vmatpush3.bf16.msra.mxu0 %v1161_v46 }
  0x68   :  { %1091 = vmatprep.subr.bf16.mxu1 %v1289_v0  ;;  %1163 = vmatprep.subr.bf16.mxu0 %v1289_v0 }
  0x6b   :  { %1093 = vmatpush3.bf16.msra.mxu1 %v1092_v34  ;;  %1165 = vmatpush3.bf16.msra.mxu0 %v1164_v52 }
  0x6c   :  { %1094 = vmatprep.subr.bf16.mxu1 %v1289_v0  ;;  %1166 = vmatprep.subr.bf16.mxu0 %v1289_v0 }
  0x6e   :  { %904 = vmatmul.mubr.f32.vlgmr.msra.gmra.mrb[0].mxu1 %v1382_v31  ;;  %1009 = vmatmul.mubr.f32.vlgmr.msra.gmra.mrb[0].mxu0 %v1382_v31 }
  0x6f   :  { %1096 = vmatpush3.bf16.msra.mxu1 %v1095_v53  ;;  %1168 = vmatpush3.bf16.msra.mxu0 %v1346_v12  ;;  %v1104_v12 = vpack.c.bf16 %v1446_v59, %v1444_v58 }
  0x70   :  { %1097 = vmatprep.subr.bf16.mxu1 %v1289_v0  ;;  %1169 = vmatprep.subr.bf16.mxu0 %v1289_v0 }
  0x71   :  { %938 = vmatprep.mubr.msk.f32.mxu1 %vm1290_vm0, %v1291_v1  ;;  %1043 = vmatprep.mubr.msk.f32.mxu0 %vm1290_vm0, %v1291_v1  ;;  %v1107_v1 = vpack.c.bf16 %v1467_v7, %v1464_v6 }
  0x73   :  { %1099 = vmatpush3.bf16.msra.mxu1 %v1098_v55  ;;  %1171 = vmatpush3.bf16.msra.mxu0 %v1350_v13  ;;  %v1110_v13 = vpack.c.bf16 %v1485_v22, %v1480_v20 }
  0x74   :  { %1100 = vmatprep.subr.bf16.mxu1 %v1289_v0  ;;  %1172 = vmatprep.subr.bf16.mxu0 %v1289_v0 }
  0x77   :  { %1102 = vmatpush3.bf16.msra.mxu1 %v1101_v30  ;;  %1174 = vmatpush3.bf16.msra.mxu0 %v1356_v18  ;;  %v1113_v18 = vpack.c.bf16 %v1501_v35, %v1496_v29 }
  0x78   :  { %1103 = vmatprep.subr.bf16.mxu1 %v1289_v0  ;;  %1175 = vmatprep.subr.bf16.mxu0 %v1289_v0 }
  0x7b   :  { %1105 = vmatpush3.bf16.msra.mxu1 %v1104_v12  ;;  %1177 = vmatpush3.bf16.msra.mxu0 %v1370_v25  ;;  %v1116_v25 = vpack.c.bf16 %v1521_v60, %v1516_v43 }
  0x7c   :  { %1106 = vmatprep.subr.bf16.mxu1 %v1289_v0  ;;  %1178 = vmatprep.subr.bf16.mxu0 %v1289_v0 }
  0x7f   :  { %1108 = vmatpush3.bf16.msra.mxu1 %v1107_v1  ;;  %1180 = vmatpush3.bf16.msra.mxu0 %v1388_v33 }
  0x80   :  { %1109 = vmatprep.subr.bf16.mxu1 %v1289_v0  ;;  %1181 = vmatprep.subr.bf16.mxu0 %v1289_v0 }
  0x83   :  { %1111 = vmatpush3.bf16.msra.mxu1 %v1110_v13  ;;  %1183 = vmatpush3.bf16.msra.mxu0 %v1412_v42 }
  0x84   :  { %1112 = vmatprep.subr.bf16.mxu1 %v1289_v0  ;;  %1184 = vmatprep.subr.bf16.mxu0 %v1289_v0 }
  0x87   :  { %1114 = vmatpush3.bf16.msra.mxu1 %v1113_v18  ;;  %1186 = vmatpush3.bf16.msra.mxu0 %v1437_v54 }
  0x88   :  { %1115 = vmatprep.subr.bf16.mxu1 %v1289_v0  ;;  %1187 = vmatprep.subr.bf16.mxu0 %v1289_v0  ;;  %v733_v0 = vld [vmem:[%s1611_s1] ss:$0 sm:$0xff] }
  0x8b   :  { %1117 = vmatpush3.bf16.msra.mxu1 %v1116_v25  ;;  %1189 = vmatpush3.bf16.msra.mxu0 %v1458_v2 }
  0x8e   :  { %939 = vmatmul.mubr.f32.vlgmr.msra.gmra.mrb[0].mxu1 %v1404_v41  ;;  %1044 = vmatmul.mubr.f32.vlgmr.msra.gmra.mrb[0].mxu0 %v1382_v31 }
 0x161   :  { %v403_v32 = vpop.f32.mrb[0].mxu1  ;;  %v698_v33 = vpop.f32.mrb[0].mxu0 }
 0x162   :  { %v1190_v38 = vadd.f32 %v698_v33, %v403_v32  ;;  %v940_v39 = vpop.f32.mrb[1].mxu1  ;;  %v1045_v42 = vpop.f32.mrb[1].mxu0 }
 0x164   :  { %v702_v48 = vmul.f32 0.03125, %v1190_v38 }
 0x166   :  { %v703_v49 = vadd.f32 1e-06, %v702_v48 }
 0x168   :  { %1209 = vrsqrt.f32 %v703_v49 }
 0x172   :  { %v1210_v54 = vpop.eup %1209 }
 0x173   :  { %v705_v58 = vmul.f32 %v1210_v54, %v1358_v21 }
 0x175   :  { %v713_v59 = vmul.f32 %v733_v0, %v705_v58 }
 0x177   :  { %714 = vst [vmem:[#allocation7] sm:$0xff] %v713_v59 }
 0x178   :  { %719 = vsyncadd [#allocation4], 64  ;;  %s1292_s14 = smov [#allocation7]  }
 0x179   :  { %s720_s15 = sshll.u32 %s1292_s14, 4  ;;  %s721_s15 = int_to_ptr.vmem [resolvable:$true] %s720_s15 }
 0x17a   :  { %s1255_s16 = scalar_lea.vmem %s721_s15, 64  ;;  %s1259_s17 = scalar_lea.vmem %s721_s15, 128 }
 0x17b   :  { %p1256_p2 = scmp.ne.s32.totalorder %s721_s15, %s1255_s16  ;;  %p1260_p3 = scmp.lt.s32.totalorder %s721_s15, %s721_s15 }
 0x17c   :  { %p1261_p4 = scmp.lt.s32.totalorder %s1259_s17, %s1255_s16 }
 0x17e   :  { %p1262_p5 = por %p1261_p4, %p1260_p3 }
 0x180   :  { %p1263_p6 = pnand %p1262_p5, %p1256_p2 }
 0x182   :  { %1266 = shalt.err (!%p1263_p6)
}
 0x183   :  { %s1267_s1 = scalar_lea.hbm %s1613_s3, 64 }
 0x184   :  { %p1268_p7 = scmp.ne.s32.totalorder %s1613_s3, %s1267_s1  ;;  %p1271_p8 = scmp.lt.u32.totalorder %s1267_s1, %s1613_s3 }
 0x186   :  { %p1273_p9 = pnand %p1271_p8, %p1268_p7 }
 0x188   :  { %1276 = shalt.err (!%p1273_p9)
}
 0x189   :  { %726 = dma.vmem_to_hbm [thread:$0]  %s721_s15, 64, %s1613_s3, [#allocation4], %s1284_s23, %s1284_s23, %s1285_s24  }
 0x18a   :  { %1281 = dma.done.wait [#allocation4], 128  }
 0x18b   :  { %1282 = vsyncadd [#allocation4], 4294967168 }
 0x18c   :  { %730 = vsyncpa [#allocation3], 1 }
 0x18d   :  { %731 = vsyncpa [#allocation6], 1 }
 0x18e   :  { %732 = vsyncpa [#allocation4], 1 }

</bundles_post_ra>
